<compile_context>
chip_gen: v7x
topology: tpu7x:2x2x1
jax: 0.10.0
libtpu: 0.0.40
codegen_flags: <defaults>
</compile_context>

<pallas_src>
import functools
import math

import jax
import jax.numpy as jnp
from jax.experimental import pallas as pl
from jax.experimental.pallas import tpu as pltpu


def self_attention_kernel(x_ref, wk_ref, wq_ref, wv_ref, wu_ref, bu_ref, o_ref,
                          *, heads, emb, block_b, seq, lane_dense_out):
    rows = block_b * seq

    xf = x_ref[...]                                   # (rows, e), already bf16

    # Fused full-width projections: (rows, heads*e) lane-dense MXU outputs,
    # f32 accumulation, then ONE full-width bf16 cast per tensor.
    # The 1/sqrt(e) score scale is already folded into Wq in the wrapper.
    q_all = jnp.dot(xf, wq_ref[...],
                    preferred_element_type=jnp.float32).astype(jnp.bfloat16)
    k_all = jnp.dot(xf, wk_ref[...],
                    preferred_element_type=jnp.float32).astype(jnp.bfloat16)
    v_all = jnp.dot(xf, wv_ref[...],
                    preferred_element_type=jnp.float32).astype(jnp.bfloat16)

    # Regroup (rows, heads*e) -> (heads*block_b, seq, e): one lane slice per
    # head + a single sublane concat + a tile-aligned leading split.  All the
    # relayout is hoisted here so the attention math below runs as ONE batched
    # dot_general over block_b*heads.
    def to_batched_heads(a2d):
        stacked = jnp.concatenate(
            [a2d[:, h * emb:(h + 1) * emb] for h in range(heads)], axis=0)
        return stacked.reshape(heads * block_b, seq, emb)

    q_bh = to_batched_heads(q_all)
    k_bh = to_batched_heads(k_all)
    v_bh = to_batched_heads(v_all)

    # Batched scores over all (head, batch) pairs; bf16 in, f32 accumulate.
    s = jnp.einsum('bqd,bkd->bqk', q_bh, k_bh,
                   preferred_element_type=jnp.float32)        # (BH, t, t)

    # Numerically-stable softmax, all elementwise math in f32; the divide goes
    # to the EUP via approximate reciprocal.
    s_max = jnp.max(s, axis=-1, keepdims=True)
    p = jnp.exp(s - s_max)
    p = p * pl.reciprocal(jnp.sum(p, axis=-1, keepdims=True), approx=True)

    out_bh = jnp.einsum('bqk,bkd->bqd', p.astype(jnp.bfloat16), v_bh,
                        preferred_element_type=jnp.float32)   # (BH, t, e)

    # Regroup back to (rows, heads*e): leading merge + one sublane slice per
    # head + a single lane concat; one bf16 cast feeding the unify matmul.
    out_2d = out_bh.reshape(heads * rows, emb)
    out_cat = jnp.concatenate(
        [out_2d[h * rows:(h + 1) * rows, :] for h in range(heads)],
        axis=-1).astype(jnp.bfloat16)                         # (rows, heads*e)

    # Single unifyheads matmul (contraction depth heads*e), then bias.
    unified = jnp.dot(out_cat, wu_ref[...],
                      preferred_element_type=jnp.float32)     # (rows, e)
    unified = unified + bu_ref[...]                           # (1, e) bcast

    if lane_dense_out:
        # Lane-dense store: repack (rows, e) -> (block_b, t*e) so the output
        # write is an unmasked full-width vst rather than masked 32-lane
        # partial stores.  Repack = sublane extracts + one lane concat.
        u3 = unified.reshape(block_b, seq, emb)
        dense = jnp.concatenate([u3[:, si, :] for si in range(seq)], axis=-1)
        o_ref[...] = dense.astype(o_ref.dtype)                # (block_b, t*e)
    else:
        o_ref[...] = unified.reshape(block_b, seq, emb).astype(o_ref.dtype)


def _num_tensorcores():
    # v7x exposes 2 TensorCores per chip; v5e / v6e have 1.  Only split the
    # grid when there is a second core to feed (review: grid=(1,) on 1-TC).
    try:
        kind = jax.devices()[0].device_kind.lower()
    except Exception:
        return 1
    return 2 if "v7" in kind else 1


def _choose_block_b(b, t, num_cores):
    # Target ~256-512 MXU rows (block_b * t) per grid step so the fused
    # projection / unify matmuls feed the MXU, while capping the per-step
    # block (instead of an unbounded b//2) so the bf16 QKV + f32 score
    # intermediates stay well inside v7x's 64 MiB VMEM.  Keep >= num_cores
    # grid steps on 2-TC parts; a single step on 1-TC parts avoids paying the
    # ~0.35 us per-step pipeline overhead more than once on tiny kernels.
    target_rows = 512
    block_b = max(1, min(b, max(1, target_rows // max(t, 1))))
    while block_b > 1 and (b + block_b - 1) // block_b < num_cores:
        block_b -= 1
    while b % block_b:
        block_b -= 1
    return block_b


def self_attention(x, wk, wq, wv, wu, bu, heads):
    b, t, e = x.shape
    assert wk.shape == (e, e * heads)
    assert wq.shape == (e, e * heads)
    assert wv.shape == (e, e * heads)
    assert wu.shape == (e * heads, e)

    num_cores = _num_tensorcores()
    block_b = _choose_block_b(b, t, num_cores)
    grid_b = b // block_b

    scale = 1.0 / math.sqrt(e)
    # bf16 weights (half the weight DMA bytes / VMEM footprint); fold the
    # 1/sqrt(e) score scale into Wq so the kernel has no scale multiply.
    # (Weights could additionally be single-buffered on v7x since their block
    # index never changes; left at the default for portability.)
    wk_b = wk.astype(jnp.bfloat16)
    wq_b = (wq * scale).astype(jnp.bfloat16)
    wv_b = wv.astype(jnp.bfloat16)
    wu_b = wu.astype(jnp.bfloat16)
    bu2d = bu.reshape(1, e).astype(jnp.float32)

    # x pre-flattened to (b*t, e) and pre-cast to bf16 in the wrapper: halves
    # the x HBM->VMEM bytes and removes the in-kernel reshape + cast.
    x2d = x.reshape(b * t, e).astype(jnp.bfloat16)

    # Lane-dense output repack is only worth it (and only unrolled) for small,
    # sublane-aligned seq; otherwise store the (block_b, t, e) block directly.
    lane_dense_out = (t % 8 == 0) and (t <= 32)

    kernel = functools.partial(self_attention_kernel, heads=heads, emb=e,
                               block_b=block_b, seq=t,
                               lane_dense_out=lane_dense_out)

    in_specs = [
        pl.BlockSpec((block_b * t, e), lambda i: (i, 0)),      # x rows (bf16)
        pl.BlockSpec((e, heads * e), lambda i: (0, 0)),        # Wk
        pl.BlockSpec((e, heads * e), lambda i: (0, 0)),        # Wq (pre-scaled)
        pl.BlockSpec((e, heads * e), lambda i: (0, 0)),        # Wv
        pl.BlockSpec((heads * e, e), lambda i: (0, 0)),        # Wu
        pl.BlockSpec((1, e), lambda i: (0, 0)),                # bias
    ]

    if lane_dense_out:
        out_shape = jax.ShapeDtypeStruct((grid_b, block_b, t * e), x.dtype)
        out_specs = pl.BlockSpec((None, block_b, t * e), lambda i: (i, 0, 0))
    else:
        out_shape = jax.ShapeDtypeStruct((b, t, e), x.dtype)
        out_specs = pl.BlockSpec((block_b, t, e), lambda i: (i, 0, 0))

    out = pl.pallas_call(
        kernel,
        out_shape=out_shape,
        grid_spec=pltpu.PrefetchScalarGridSpec(
            num_scalar_prefetch=0,
            grid=(grid_b,),
            in_specs=in_specs,
            out_specs=out_specs,
        ),
        compiler_params=pltpu.CompilerParams(
            dimension_semantics=("parallel",)),
    )(x2d, wk_b, wq_b, wv_b, wu_b, bu2d)

    if lane_dense_out:
        out = out.reshape(b, t, e)
    return out


def self_attention_reference(x, wk, wq, wv, wu, bu, h):
    """Pure-JAX (f32) replica of the PyTorch forward, for verification."""
    b, t, e = x.shape
    keys = (x @ wk).reshape(b, t, h, e).transpose(0, 2, 1, 3).reshape(b * h, t, e)
    queries = (x @ wq).reshape(b, t, h, e).transpose(0, 2, 1, 3).reshape(b * h, t, e)
    values = (x @ wv).reshape(b, t, h, e).transpose(0, 2, 1, 3).reshape(b * h, t, e)
    dot = jnp.einsum('bqe,bke->bqk', queries, keys) / math.sqrt(e)
    dot = jax.nn.softmax(dot, axis=2)
    out = jnp.einsum('bqk,bke->bqe', dot, values)
    out = out.reshape(b, h, t, e).transpose(0, 2, 1, 3).reshape(b, t, h * e)
    return out @ wu + bu


if __name__ == "__main__":
    b, t, e, heads = 2, 8, 32, 4

    key = jax.random.PRNGKey(0)
    k_x, k_wk, k_wq, k_wv, k_wu, k_bu = jax.random.split(key, 6)

    x = jax.random.normal(k_x, (b, t, e), dtype=jnp.float32)
    # Deterministic synthetic parameters (shapes match the nn.Linear layers;
    # weights stored transposed relative to torch so y = x @ W + b).
    wk = jax.random.normal(k_wk, (e, e * heads), dtype=jnp.float32) * 0.05
    wq = jax.random.normal(k_wq, (e, e * heads), dtype=jnp.float32) * 0.05
    wv = jax.random.normal(k_wv, (e, e * heads), dtype=jnp.float32) * 0.05
    wu = jax.random.normal(k_wu, (e * heads, e), dtype=jnp.float32) * 0.05
    bu = jax.random.normal(k_bu, (e,), dtype=jnp.float32) * 0.01

    # TODO(synk): vis=True early-return and mask/'first' branches of the
    # original module are not implemented (defaults vis=False, mask=False).
    out = self_attention(x, wk, wq, wv, wu, bu, heads)
    out = jax.block_until_ready(out)

    ref = self_attention_reference(x, wk, wq, wv, wu, bu, heads)
    assert out.shape == (b, t, e)
    # Tolerance reflects bf16 matmul inputs (f32 accumulation) and the
    # approximate softmax reciprocal in the kernel vs. the f32 reference.
    assert jnp.allclose(out, ref, atol=2e-2, rtol=2e-2), (
        f"max abs err {jnp.max(jnp.abs(out - ref))}")

    print("KERNEL_OK")
</pallas_src>

<mosaic_0001>
module attributes {stable_mosaic.version = 11 : i64} {
  func.func @self_attention_kernel(%arg0: i32, %arg1: memref<16x32xbf16, #tpu.memory_space<vmem>>, %arg2: memref<32x128xbf16, #tpu.memory_space<vmem>>, %arg3: memref<32x128xbf16, #tpu.memory_space<vmem>>, %arg4: memref<32x128xbf16, #tpu.memory_space<vmem>>, %arg5: memref<128x32xbf16, #tpu.memory_space<vmem>>, %arg6: memref<1x32xf32, #tpu.memory_space<vmem>>, %arg7: memref<1x2x256xf32, #tpu.memory_space<vmem>>) attributes {dimension_semantics = [#tpu.dimension_semantics<parallel>], iteration_bounds = array<i64: 1>, scalar_prefetch = 0 : i64, scratch_operands = 0 : i64, tpu.core_type = #tpu.core_type<tc>, window_params = [{transform_indices = @transform_0, window_bounds = array<i64: 16, 32>}, {pipeline_mode = #tpu.pipeline_mode<synchronous>, transform_indices = @transform_1, window_bounds = array<i64: 32, 128>}, {pipeline_mode = #tpu.pipeline_mode<synchronous>, transform_indices = @transform_2, window_bounds = array<i64: 32, 128>}, {pipeline_mode = #tpu.pipeline_mode<synchronous>, transform_indices = @transform_3, window_bounds = array<i64: 32, 128>}, {pipeline_mode = #tpu.pipeline_mode<synchronous>, transform_indices = @transform_4, window_bounds = array<i64: 128, 32>}, {pipeline_mode = #tpu.pipeline_mode<synchronous>, transform_indices = @transform_5, window_bounds = array<i64: 1, 32>}, {transform_indices = @transform_6, window_bounds = array<i64: 1, 2, 256>}]} {
    %c0 = arith.constant 0 : index
    %c0_0 = arith.constant 0 : index
    %0 = vector.load %arg1[%c0, %c0_0] : memref<16x32xbf16, #tpu.memory_space<vmem>>, vector<16x32xbf16>
    %c0_1 = arith.constant 0 : index
    %c0_2 = arith.constant 0 : index
    %1 = vector.load %arg3[%c0_1, %c0_2] : memref<32x128xbf16, #tpu.memory_space<vmem>>, vector<32x128xbf16>
    %cst = arith.constant dense<0.000000e+00> : vector<16x128xf32>
    %2 = tpu.matmul %0, %1, %cst {dimension_numbers = #tpu.dot_dimension_numbers<[1], [0], [0], [1], [0, 0, 1, 1], [], []>} : vector<16x32xbf16>, vector<32x128xbf16>, vector<16x128xf32> -> vector<16x128xf32>
    %3 = arith.truncf %2 : vector<16x128xf32> to vector<16x128xbf16>
    %c0_3 = arith.constant 0 : index
    %c0_4 = arith.constant 0 : index
    %4 = vector.load %arg2[%c0_3, %c0_4] : memref<32x128xbf16, #tpu.memory_space<vmem>>, vector<32x128xbf16>
    %cst_5 = arith.constant dense<0.000000e+00> : vector<16x128xf32>
    %5 = tpu.matmul %0, %4, %cst_5 {dimension_numbers = #tpu.dot_dimension_numbers<[1], [0], [0], [1], [0, 0, 1, 1], [], []>} : vector<16x32xbf16>, vector<32x128xbf16>, vector<16x128xf32> -> vector<16x128xf32>
    %6 = arith.truncf %5 : vector<16x128xf32> to vector<16x128xbf16>
    %c0_6 = arith.constant 0 : index
    %c0_7 = arith.constant 0 : index
    %7 = vector.load %arg4[%c0_6, %c0_7] : memref<32x128xbf16, #tpu.memory_space<vmem>>, vector<32x128xbf16>
    %cst_8 = arith.constant dense<0.000000e+00> : vector<16x128xf32>
    %8 = tpu.matmul %0, %7, %cst_8 {dimension_numbers = #tpu.dot_dimension_numbers<[1], [0], [0], [1], [0, 0, 1, 1], [], []>} : vector<16x32xbf16>, vector<32x128xbf16>, vector<16x128xf32> -> vector<16x128xf32>
    %9 = arith.truncf %8 : vector<16x128xf32> to vector<16x128xbf16>
    %10 = vector.extract_strided_slice %3 {offsets = [0, 0], sizes = [16, 32], strides = [1, 1]} : vector<16x128xbf16> to vector<16x32xbf16>
    %11 = vector.extract_strided_slice %3 {offsets = [0, 32], sizes = [16, 32], strides = [1, 1]} : vector<16x128xbf16> to vector<16x32xbf16>
    %12 = vector.extract_strided_slice %3 {offsets = [0, 64], sizes = [16, 32], strides = [1, 1]} : vector<16x128xbf16> to vector<16x32xbf16>
    %13 = vector.extract_strided_slice %3 {offsets = [0, 96], sizes = [16, 32], strides = [1, 1]} : vector<16x128xbf16> to vector<16x32xbf16>
    %14 = tpu.concatenate %10, %11, %12, %13 in 0 : vector<16x32xbf16>, vector<16x32xbf16>, vector<16x32xbf16>, vector<16x32xbf16> -> vector<64x32xbf16>
    %15 = vector.shape_cast %14 : vector<64x32xbf16> to vector<8x8x32xbf16>
    %16 = vector.extract_strided_slice %6 {offsets = [0, 0], sizes = [16, 32], strides = [1, 1]} : vector<16x128xbf16> to vector<16x32xbf16>
    %17 = vector.extract_strided_slice %6 {offsets = [0, 32], sizes = [16, 32], strides = [1, 1]} : vector<16x128xbf16> to vector<16x32xbf16>
    %18 = vector.extract_strided_slice %6 {offsets = [0, 64], sizes = [16, 32], strides = [1, 1]} : vector<16x128xbf16> to vector<16x32xbf16>
    %19 = vector.extract_strided_slice %6 {offsets = [0, 96], sizes = [16, 32], strides = [1, 1]} : vector<16x128xbf16> to vector<16x32xbf16>
    %20 = tpu.concatenate %16, %17, %18, %19 in 0 : vector<16x32xbf16>, vector<16x32xbf16>, vector<16x32xbf16>, vector<16x32xbf16> -> vector<64x32xbf16>
    %21 = vector.shape_cast %20 : vector<64x32xbf16> to vector<8x8x32xbf16>
    %22 = vector.extract_strided_slice %9 {offsets = [0, 0], sizes = [16, 32], strides = [1, 1]} : vector<16x128xbf16> to vector<16x32xbf16>
    %23 = vector.extract_strided_slice %9 {offsets = [0, 32], sizes = [16, 32], strides = [1, 1]} : vector<16x128xbf16> to vector<16x32xbf16>
    %24 = vector.extract_strided_slice %9 {offsets = [0, 64], sizes = [16, 32], strides = [1, 1]} : vector<16x128xbf16> to vector<16x32xbf16>
    %25 = vector.extract_strided_slice %9 {offsets = [0, 96], sizes = [16, 32], strides = [1, 1]} : vector<16x128xbf16> to vector<16x32xbf16>
    %26 = tpu.concatenate %22, %23, %24, %25 in 0 : vector<16x32xbf16>, vector<16x32xbf16>, vector<16x32xbf16>, vector<16x32xbf16> -> vector<64x32xbf16>
    %27 = vector.shape_cast %26 : vector<64x32xbf16> to vector<8x8x32xbf16>
    "tpu.trace_start"() <{level = 10 : i32, message = "bqd,bkd->bqk"}> : () -> ()
    %cst_9 = arith.constant dense<0.000000e+00> : vector<8x8x8xf32>
    %28 = tpu.matmul %15, %21, %cst_9 {dimension_numbers = #tpu.dot_dimension_numbers<[2], [2], [1], [1], [0, 0, 0, 1, 1, 1], [0], [0]>} : vector<8x8x32xbf16>, vector<8x8x32xbf16>, vector<8x8x8xf32> -> vector<8x8x8xf32>
    "tpu.trace_stop"() : () -> ()
    %cst_10 = arith.constant dense<0xFF800000> : vector<8x8xf32>
    %29 = vector.multi_reduction <maximumf>, %28, %cst_10 [2] : vector<8x8x8xf32> to vector<8x8xf32>
    %30 = vector.shape_cast %29 : vector<8x8xf32> to vector<8x8x1xf32>
    %31 = vector.broadcast %30 : vector<8x8x1xf32> to vector<8x8x8xf32>
    %32 = arith.subf %28, %31 : vector<8x8x8xf32>
    %33 = math.exp %32 : vector<8x8x8xf32>
    %cst_11 = arith.constant dense<0.000000e+00> : vector<8x8xf32>
    %34 = vector.multi_reduction <add>, %33, %cst_11 [2] : vector<8x8x8xf32> to vector<8x8xf32>
    %35 = vector.shape_cast %34 : vector<8x8xf32> to vector<8x8x1xf32>
    %36 = tpu.reciprocal %35 {approx = true} : vector<8x8x1xf32> -> vector<8x8x1xf32>
    %37 = vector.broadcast %36 : vector<8x8x1xf32> to vector<8x8x8xf32>
    %38 = arith.mulf %33, %37 : vector<8x8x8xf32>
    %39 = arith.truncf %38 : vector<8x8x8xf32> to vector<8x8x8xbf16>
    "tpu.trace_start"() <{level = 10 : i32, message = "bqk,bkd->bqd"}> : () -> ()
    %cst_12 = arith.constant dense<0.000000e+00> : vector<8x8x32xf32>
    %40 = tpu.matmul %39, %27, %cst_12 {dimension_numbers = #tpu.dot_dimension_numbers<[2], [1], [1], [2], [0, 0, 0, 1, 1, 2], [0], [0]>} : vector<8x8x8xbf16>, vector<8x8x32xbf16>, vector<8x8x32xf32> -> vector<8x8x32xf32>
    "tpu.trace_stop"() : () -> ()
    %41 = vector.shape_cast %40 : vector<8x8x32xf32> to vector<64x32xf32>
    %42 = vector.extract_strided_slice %41 {offsets = [0, 0], sizes = [16, 32], strides = [1, 1]} : vector<64x32xf32> to vector<16x32xf32>
    %43 = vector.extract_strided_slice %41 {offsets = [16, 0], sizes = [16, 32], strides = [1, 1]} : vector<64x32xf32> to vector<16x32xf32>
    %44 = vector.extract_strided_slice %41 {offsets = [32, 0], sizes = [16, 32], strides = [1, 1]} : vector<64x32xf32> to vector<16x32xf32>
    %45 = vector.extract_strided_slice %41 {offsets = [48, 0], sizes = [16, 32], strides = [1, 1]} : vector<64x32xf32> to vector<16x32xf32>
    %46 = tpu.concatenate %42, %43, %44, %45 in 1 : vector<16x32xf32>, vector<16x32xf32>, vector<16x32xf32>, vector<16x32xf32> -> vector<16x128xf32>
    %47 = arith.truncf %46 : vector<16x128xf32> to vector<16x128xbf16>
    %c0_13 = arith.constant 0 : index
    %c0_14 = arith.constant 0 : index
    %48 = vector.load %arg5[%c0_13, %c0_14] : memref<128x32xbf16, #tpu.memory_space<vmem>>, vector<128x32xbf16>
    %cst_15 = arith.constant dense<0.000000e+00> : vector<16x32xf32>
    %49 = tpu.matmul %47, %48, %cst_15 {dimension_numbers = #tpu.dot_dimension_numbers<[1], [0], [0], [1], [0, 0, 1, 1], [], []>} : vector<16x128xbf16>, vector<128x32xbf16>, vector<16x32xf32> -> vector<16x32xf32>
    %c0_16 = arith.constant 0 : index
    %c0_17 = arith.constant 0 : index
    %50 = vector.load %arg6[%c0_16, %c0_17] : memref<1x32xf32, #tpu.memory_space<vmem>>, vector<1x32xf32>
    %51 = vector.broadcast %50 : vector<1x32xf32> to vector<16x32xf32>
    %52 = arith.addf %49, %51 : vector<16x32xf32>
    %53 = vector.shape_cast %52 : vector<16x32xf32> to vector<2x8x32xf32>
    %54 = vector.extract_strided_slice %53 {offsets = [0, 0, 0], sizes = [2, 1, 32], strides = [1, 1, 1]} : vector<2x8x32xf32> to vector<2x1x32xf32>
    %55 = vector.shape_cast %54 : vector<2x1x32xf32> to vector<2x32xf32>
    %56 = vector.extract_strided_slice %53 {offsets = [0, 1, 0], sizes = [2, 1, 32], strides = [1, 1, 1]} : vector<2x8x32xf32> to vector<2x1x32xf32>
    %57 = vector.shape_cast %56 : vector<2x1x32xf32> to vector<2x32xf32>
    %58 = vector.extract_strided_slice %53 {offsets = [0, 2, 0], sizes = [2, 1, 32], strides = [1, 1, 1]} : vector<2x8x32xf32> to vector<2x1x32xf32>
    %59 = vector.shape_cast %58 : vector<2x1x32xf32> to vector<2x32xf32>
    %60 = vector.extract_strided_slice %53 {offsets = [0, 3, 0], sizes = [2, 1, 32], strides = [1, 1, 1]} : vector<2x8x32xf32> to vector<2x1x32xf32>
    %61 = vector.shape_cast %60 : vector<2x1x32xf32> to vector<2x32xf32>
    %62 = vector.extract_strided_slice %53 {offsets = [0, 4, 0], sizes = [2, 1, 32], strides = [1, 1, 1]} : vector<2x8x32xf32> to vector<2x1x32xf32>
    %63 = vector.shape_cast %62 : vector<2x1x32xf32> to vector<2x32xf32>
    %64 = vector.extract_strided_slice %53 {offsets = [0, 5, 0], sizes = [2, 1, 32], strides = [1, 1, 1]} : vector<2x8x32xf32> to vector<2x1x32xf32>
    %65 = vector.shape_cast %64 : vector<2x1x32xf32> to vector<2x32xf32>
    %66 = vector.extract_strided_slice %53 {offsets = [0, 6, 0], sizes = [2, 1, 32], strides = [1, 1, 1]} : vector<2x8x32xf32> to vector<2x1x32xf32>
    %67 = vector.shape_cast %66 : vector<2x1x32xf32> to vector<2x32xf32>
    %68 = vector.extract_strided_slice %53 {offsets = [0, 7, 0], sizes = [2, 1, 32], strides = [1, 1, 1]} : vector<2x8x32xf32> to vector<2x1x32xf32>
    %69 = vector.shape_cast %68 : vector<2x1x32xf32> to vector<2x32xf32>
    %70 = tpu.concatenate %55, %57, %59, %61, %63, %65, %67, %69 in 1 : vector<2x32xf32>, vector<2x32xf32>, vector<2x32xf32>, vector<2x32xf32>, vector<2x32xf32>, vector<2x32xf32>, vector<2x32xf32>, vector<2x32xf32> -> vector<2x256xf32>
    %c0_18 = arith.constant 0 : index
    %c0_19 = arith.constant 0 : index
    %c0_20 = arith.constant 0 : index
    %71 = vector.load %arg7[%c0_18, %c0_19, %c0_20] : memref<1x2x256xf32, #tpu.memory_space<vmem>>, vector<1x2x256xf32>
    %72 = vector.shape_cast %71 : vector<1x2x256xf32> to vector<2x256xf32>
    %73 = vector.shape_cast %70 : vector<2x256xf32> to vector<1x2x256xf32>
    tpu.vector_store %arg7[%c0_18, %c0_19, %c0_20], %73 {strides = array<i32>} : memref<1x2x256xf32, #tpu.memory_space<vmem>>, vector<1x2x256xf32>,
    return
  }
  func.func @transform_0(%arg0: i32) -> (i32, i32) {
    %c0_i32 = arith.constant 0 : i32
    %c0_i32_0 = arith.constant 0 : i32
    return %arg0, %c0_i32 : i32, i32
  }
  func.func @transform_1(%arg0: i32) -> (i32, i32) {
    %c0_i32 = arith.constant 0 : i32
    %c0_i32_0 = arith.constant 0 : i32
    %c0_i32_1 = arith.constant 0 : i32
    return %c0_i32, %c0_i32_0 : i32, i32
  }
  func.func @transform_2(%arg0: i32) -> (i32, i32) {
    %c0_i32 = arith.constant 0 : i32
    %c0_i32_0 = arith.constant 0 : i32
    %c0_i32_1 = arith.constant 0 : i32
    return %c0_i32, %c0_i32_0 : i32, i32
  }
  func.func @transform_3(%arg0: i32) -> (i32, i32) {
    %c0_i32 = arith.constant 0 : i32
    %c0_i32_0 = arith.constant 0 : i32
    %c0_i32_1 = arith.constant 0 : i32
    return %c0_i32, %c0_i32_0 : i32, i32
  }
  func.func @transform_4(%arg0: i32) -> (i32, i32) {
    %c0_i32 = arith.constant 0 : i32
    %c0_i32_0 = arith.constant 0 : i32
    %c0_i32_1 = arith.constant 0 : i32
    return %c0_i32, %c0_i32_0 : i32, i32
  }
  func.func @transform_5(%arg0: i32) -> (i32, i32) {
    %c0_i32 = arith.constant 0 : i32
    %c0_i32_0 = arith.constant 0 : i32
    %c0_i32_1 = arith.constant 0 : i32
    return %c0_i32, %c0_i32_0 : i32, i32
  }
  func.func @transform_6(%arg0: i32) -> (i32, i32, i32) {
    %c0_i32 = arith.constant 0 : i32
    %c0_i32_0 = arith.constant 0 : i32
    %c0_i32_1 = arith.constant 0 : i32
    return %arg0, %c0_i32, %c0_i32_0 : i32, i32, i32
  }
}

</mosaic_0001>

<bundles_post_ra>
// kernel: tpu_custom_call.1
= control target key start
LH: loop header
LB: loop body
LE: loop exit
PB: predicated region body
PF: predicated region fallthrough
CT: control target
= control target key end

     0   :  { %v1683_v1 = vmov 0.0   ;;  %vm1684_vm0 = vmmov 0   ;;  %vm48_vm1 = vcmask 261120   ;;  %s1971_s0 = inlined_call_operand.vmem [shape: bf16[16,32], index: 0, kind: input, shape index: {}]   ;;  %s1972_s1 = inlined_call_operand.vmem [shape: bf16[32,128], index: 1, kind: input, shape index: {}]   ;;  %s1973_s2 = inlined_call_operand.vmem [shape: bf16[32,128], index: 2, kind: input, shape index: {}]   ;;  %s1974_s3 = inlined_call_operand.vmem [shape: bf16[32,128], index: 3, kind: input, shape index: {}]   ;;  %s1975_s4 = inlined_call_operand.vmem [shape: bf16[128,32], index: 4, kind: input, shape index: {}]   ;;  %s1976_s5 = inlined_call_operand.vmem [shape: f32[1,32], index: 5, kind: input, shape index: {}]   ;;  %s1977_s6 = inlined_call_operand.hbm [shape: f32[1,2,256], index: 6, kind: output, shape index: {}]  }
   0x1   :  { %v1612_v0 = vld [vmem:[%s1973_s2] sm:$0xff]   ;;  %1451 = vmatprep.subr.bf16.mxu0 %v1683_v1  ;;  %1475 = vmatprep.subr.bf16.mxu1 %v1683_v1  ;;  %v1613_v2 = vld [vmem:[%s1973_s2 + $0x8] sm:$0xff]  }
   0x2   :  { %1452 = vmatpush3.bf16.msra.mxu0 %v1612_v0  ;;  %1455 = vmatprep.mubr.msk.bf16.mxu0 %vm1684_vm0, %v1683_v1  ;;  %v1614_v3 = vld [vmem:[%s1971_s0] sm:$0xff]   ;;  %v1616_v5 = vld [vmem:[%s1972_s1 + $0x8] sm:$0xff]  }
   0x3   :  { %1453 = vmatprep.subr.bf16.mxu0 %v1683_v1  ;;  %1477 = vmatprep.mubr.msk.bf16.mxu1 %vm1684_vm0, %v1683_v1  ;;  %v1615_v4 = vld [vmem:[%s1972_s1] sm:$0xff]  }
   0x6   :  { %1454 = vmatpush3.bf16.msra.mxu0 %v1613_v2 }
   0x7   :  { %1459 = vmatprep.subr.bf16.mxu0 %v1683_v1 }
   0x9   :  { %1456 = vmatmul.mubr.msk.bf16.vlgmr.msra.gmra.mrb[0].mxu0 %vm48_vm1, %v1614_v3 }
   0xa   :  { %1460 = vmatpush3.bf16.msra.mxu0 %v1615_v4  ;;  %1463 = vmatprep.mubr.msk.bf16.mxu0 %vm1684_vm0, %v1683_v1 }
   0xb   :  { %1461 = vmatprep.subr.bf16.mxu0 %v1683_v1 }
   0xc   :  { %11 = vsyncpa [#allocation3], 0  ;;  %v1617_v6 = vld [vmem:[%s1974_s3] sm:$0xff]   ;;  %v1618_v7 = vld [vmem:[%s1974_s3 + $0x8] sm:$0xff]   ;;  %s1685_s3 = smov 64   ;;  %s1686_s8 = smov 96  }
   0xd   :  { %s1687_s9 = smov 32   ;;  %vm747_vm2 = vcmask 1043456   ;;  %vm647_vm3 = vcmask 64512   ;;  %vm1139_vm4 = vcmask 523264   ;;  %vm1142_vm5 = vcmask 785408  }
   0xe   :  { %1462 = vmatpush3.bf16.msra.mxu0 %v1616_v5  ;;  %vm1261_vm6 = vcmask 1041409  }
   0xf   :  { %1467 = vmatprep.subr.bf16.mxu0 %v1683_v1 }
  0x11   :  { %1464 = vmatmul.mubr.msk.bf16.vlgmr.msra.gmra.mrb[4].mxu0 %vm48_vm1, %v1614_v3 }
  0x12   :  { %1471 = vmatprep.mubr.msk.bf16.mxu0 %vm1684_vm0, %v1683_v1  ;;  %1468 = vmatpush3.bf16.msra.mxu0 %v1617_v6 }
  0x13   :  { %1469 = vmatprep.subr.bf16.mxu0 %v1683_v1 }
  0x16   :  { %1470 = vmatpush3.bf16.msra.mxu0 %v1618_v7 }
  0x17   :  { %1481 = vmatprep.subr.bf16.mxu0 %v1683_v1 }
  0x19   :  { %1472 = vmatmul.mubr.msk.bf16.vlgmr.msra.gmra.mrb[8].mxu0 %vm48_vm1, %v1614_v3 }
  0x1a   :  { %1483 = vmatprep.mubr.msk.bf16.mxu0 %vm1684_vm0, %v1683_v1 }
  0xdc   :  { %v86_v8 = vpop.f32.mrb[0].mxu0 }
  0xdd   :  { %v1457_v9 = vpop.f32.mrb[1].mxu0  ;;  %v1395_v22 = vpack.c.bf16 %v86_v8, %v86_v8 }
  0xde   :  { %v89_v10 = vpop.f32.mrb[2].mxu0 }
  0xdf   :  { %v93_v11 = vpack.c.bf16 %v89_v10, %v86_v8  ;;  %v1458_v12 = vpop.f32.mrb[3].mxu0  ;;  %v1396_v23 = vpack.c.bf16 %v89_v10, %v89_v10 }
  0xe4   :  { %v144_v13 = vpop.f32.mrb[4].mxu0 }
  0xe5   :  { %v1397_v14 = vpack.c.bf16 %v144_v13, %v144_v13  ;;  %v1465_v15 = vpop.f32.mrb[5].mxu0 }
  0xe6   :  { %v147_v16 = vpop.f32.mrb[6].mxu0 }
  0xe7   :  { %v151_v17 = vpack.c.bf16 %v147_v16, %v144_v13  ;;  %v1398_v18 = vpack.c.bf16 %v147_v16, %v147_v16  ;;  %v1466_v19 = vpop.f32.mrb[7].mxu0  ;;  %v283_v20 = vsel %vm48_vm1, %v1397_v14, 0 }
  0xe8   :  { %1476 = vmatpush3.bf16.xpose.msra.mxu1 %v283_v20 }
  0xe9   :  { %236 = vrot.lane.b32.xlu1 %v151_v17, %s1685_s3  ;;  %234 = vrot.lane.b32.xlu0 %v151_v17, %s1686_s8  ;;  %v329_v21 = vsel %vm48_vm1, %v1398_v18, 0 }
  0xea   :  { %1482 = vmatpush3.bf16.xpose.msra.mxu0 %v329_v21  ;;  %1487 = vmatprep.subr.bf16.mxu1 %v1683_v1 }
  0xeb   :  { %1493 = vmatprep.subr.bf16.mxu0 %v1683_v1 }
  0xec   :  { %v202_v24 = vpop.f32.mrb[8].mxu0 }
  0xed   :  { %213 = vrot.lane.b32.xlu1 %v93_v11, %s1685_s3  ;;  %211 = vrot.lane.b32.xlu0 %v93_v11, %s1686_s8  ;;  %v1473_v25 = vpop.f32.mrb[9].mxu0  ;;  %v1399_v50 = vpack.c.bf16 %v202_v24, %v202_v24 }
  0xee   :  { %v205_v26 = vpop.f32.mrb[10].mxu0 }
  0xef   :  { %1478 = vmatmul.mubr.msk.bf16.vlgmr.msra.gmra.mrb[0].mxu1 %vm48_vm1, %v1395_v22  ;;  %v1782_v27 = vpack.c.bf16 %v205_v26, %v202_v24  ;;  %v1474_v28 = vpop.f32.mrb[11].mxu0  ;;  %v1400_v51 = vpack.c.bf16 %v205_v26, %v205_v26  ;;  %v749_v55 = vsel %vm747_vm2, %v1399_v50, 0 }
  0xf0   :  { %1489 = vmatprep.mubr.msk.bf16.mxu1 %vm1684_vm0, %v1683_v1 }
  0xf1   :  { %1484 = vmatmul.mubr.msk.bf16.vlgmr.msra.gmra.mrb[12].mxu0 %vm48_vm1, %v1396_v23  ;;  %215 = vrot.lane.b32.xlu1 %v93_v11, %s1687_s9  ;;  %v795_v56 = vsel %vm747_vm2, %v1400_v51, 0 }
  0xf2   :  { %238 = vrot.lane.b32.xlu0 %v151_v17, %s1687_s9  ;;  %1495 = vmatprep.mubr.msk.bf16.mxu0 %vm1684_vm0, %v1683_v1 }
 0x15b   :  { %v235_v29 = vpop.permute.xlu0 %234  ;;  %v237_v34 = vpop.permute.xlu1 %236 }
 0x15c   :  { %v1355_v30 = vcombine.low %v235_v29, %v235_v29  ;;  %v1356_v31 = vcombine.high %v235_v29, %v235_v29  ;;  %v1357_v36 = vcombine.low %v237_v34, %v237_v34  ;;  %v1358_v37 = vcombine.high %v237_v34, %v237_v34 }
 0x15e   :  { %v375_v32 = vsel %vm48_vm1, %v1355_v30, 0  ;;  %v421_v33 = vsel %vm48_vm1, %v1356_v31, 0  ;;  %v467_v40 = vsel %vm48_vm1, %v1357_v36, 0  ;;  %v513_v41 = vsel %vm48_vm1, %v1358_v37, 0 }
 0x15f   :  { %1488 = vmatpush3.bf16.xpose.msra.mxu1 %v375_v32  ;;  %1494 = vmatpush3.bf16.xpose.msra.mxu0 %v421_v33  ;;  %v212_v35 = vpop.permute.xlu0 %211  ;;  %v214_v43 = vpop.permute.xlu1 %213 }
 0x160   :  { %1499 = vmatprep.subr.bf16.mxu1 %v1683_v1  ;;  %1505 = vmatprep.subr.bf16.mxu0 %v1683_v1  ;;  %v1347_v38 = vcombine.low %v212_v35, %v212_v35  ;;  %v1348_v39 = vcombine.high %v212_v35, %v212_v35  ;;  %v1349_v46 = vcombine.low %v214_v43, %v214_v43 }
 0x161   :  { %v1350_v47 = vcombine.high %v214_v43, %v214_v43 }
 0x163   :  { %v216_v52 = vpop.permute.xlu1 %215 }
 0x164   :  { %v239_v42 = vpop.permute.xlu0 %238  ;;  %v1351_v53 = vcombine.low %v216_v52, %v216_v52  ;;  %v1352_v54 = vcombine.high %v216_v52, %v216_v52 }
 0x165   :  { %v1359_v44 = vcombine.low %v239_v42, %v239_v42  ;;  %v1360_v45 = vcombine.high %v239_v42, %v239_v42 }
 0x166   :  { %1490 = vmatmul.mubr.msk.bf16.vlgmr.msra.gmra.mrb[4].mxu1 %vm48_vm1, %v1347_v38  ;;  %1496 = vmatmul.mubr.msk.bf16.vlgmr.msra.gmra.mrb[16].mxu0 %vm48_vm1, %v1348_v39 }
 0x167   :  { %1500 = vmatpush3.bf16.xpose.msra.mxu1 %v467_v40  ;;  %1506 = vmatpush3.bf16.xpose.msra.mxu0 %v513_v41  ;;  %v559_v48 = vsel %vm48_vm1, %v1359_v44, 0  ;;  %v605_v49 = vsel %vm48_vm1, %v1360_v45, 0 }
 0x168   :  { %1501 = vmatprep.mubr.msk.bf16.mxu1 %vm1684_vm0, %v1683_v1  ;;  %1507 = vmatprep.mubr.msk.bf16.mxu0 %vm1684_vm0, %v1683_v1 }
 0x169   :  { %1511 = vmatprep.subr.bf16.mxu1 %v1683_v1  ;;  %1517 = vmatprep.subr.bf16.mxu0 %v1683_v1 }
 0x16e   :  { %1502 = vmatmul.mubr.msk.bf16.vlgmr.msra.gmra.mrb[8].mxu1 %vm48_vm1, %v1349_v46  ;;  %1508 = vmatmul.mubr.msk.bf16.vlgmr.msra.gmra.mrb[20].mxu0 %vm48_vm1, %v1350_v47 }
 0x16f   :  { %1512 = vmatpush3.bf16.xpose.msra.mxu1 %v559_v48  ;;  %1518 = vmatpush3.bf16.xpose.msra.mxu0 %v605_v49 }
 0x170   :  { %1513 = vmatprep.mubr.msk.bf16.mxu1 %vm1684_vm0, %v1683_v1  ;;  %1519 = vmatprep.mubr.msk.bf16.mxu0 %vm1684_vm0, %v1683_v1 }
 0x171   :  { %1523 = vmatprep.subr.bf16.mxu1 %v1683_v1  ;;  %1529 = vmatprep.subr.bf16.mxu0 %v1683_v1 }
 0x176   :  { %1514 = vmatmul.mubr.msk.bf16.vlgmr.msra.gmra.mrb[12].mxu1 %vm48_vm1, %v1351_v53  ;;  %1520 = vmatmul.mubr.msk.bf16.vlgmr.msra.gmra.mrb[24].mxu0 %vm48_vm1, %v1352_v54 }
 0x177   :  { %1524 = vmatpush3.bf16.msra.mxu1 %v749_v55  ;;  %1530 = vmatpush3.bf16.msra.mxu0 %v795_v56 }
 0x178   :  { %1531 = vmatprep.mubr.msk.bf16.mxu0 %vm1684_vm0, %v1683_v1  ;;  %1541 = vmatprep.subr.bf16.mxu0 %v1683_v1 }
 0x179   :  { %1525 = vmatprep.mubr.msk.bf16.mxu1 %vm1684_vm0, %v1683_v1  ;;  %1535 = vmatprep.subr.bf16.mxu1 %v1683_v1 }
 0x1c2   :  { %v319_v57 = vpop.f32.mrb[0].mxu1 }
 0x1c3   :  { %v1479_v58 = vpop.f32.mrb[1].mxu1  ;;  %v648_v59 = vsel %vm647_vm3, %v319_v57, -inf }
 0x1c4   :  { %v322_v60 = vpop.f32.mrb[2].mxu1  ;;  %649 = vmax.xlane.f32.xlu0 %v648_v59  ;;  %v365_v61 = vpop.f32.mrb[12].mxu0 }
 0x1c5   :  { %v1480_v62 = vpop.f32.mrb[3].mxu1  ;;  %v1485_v63 = vpop.f32.mrb[13].mxu0  ;;  %v651_v0 = vsel %vm647_vm3, %v365_v61, -inf }
 0x1c6   :  { %652 = vmax.xlane.f32.xlu1 %v651_v0  ;;  %v368_v2 = vpop.f32.mrb[14].mxu0 }
 0x1c7   :  { %v1486_v3 = vpop.f32.mrb[15].mxu0 }
 0x239   :  { %v411_v4 = vpop.f32.mrb[4].mxu1  ;;  %v457_v5 = vpop.f32.mrb[16].mxu0 }
 0x23a   :  { %v1491_v6 = vpop.f32.mrb[5].mxu1  ;;  %v1497_v7 = vpop.f32.mrb[17].mxu0  ;;  %v654_v8 = vsel %vm647_vm3, %v411_v4, -inf  ;;  %v657_v13 = vsel %vm647_vm3, %v457_v5, -inf }
 0x23b   :  { %655 = vmax.xlane.f32.xlu0 %v654_v8  ;;  %v414_v9 = vpop.f32.mrb[6].mxu1  ;;  %v460_v10 = vpop.f32.mrb[18].mxu0 }
 0x23c   :  { %v1492_v11 = vpop.f32.mrb[7].mxu1  ;;  %v1498_v12 = vpop.f32.mrb[19].mxu0 }
 0x23f   :  { %658 = vmax.xlane.f32.xlu0 %v657_v13 }
 0x241   :  { %v503_v14 = vpop.f32.mrb[8].mxu1  ;;  %v549_v15 = vpop.f32.mrb[20].mxu0 }
 0x242   :  { %v1503_v16 = vpop.f32.mrb[9].mxu1  ;;  %v1509_v17 = vpop.f32.mrb[21].mxu0  ;;  %v660_v18 = vsel %vm647_vm3, %v503_v14, -inf  ;;  %v663_v19 = vsel %vm647_vm3, %v549_v15, -inf }
 0x243   :  { %v506_v20 = vpop.f32.mrb[10].mxu1  ;;  %661 = vmax.xlane.f32.xlu1 %v660_v18  ;;  %664 = vmax.xlane.f32.xlu0 %v663_v19  ;;  %v552_v21 = vpop.f32.mrb[22].mxu0 }
 0x244   :  { %v1504_v22 = vpop.f32.mrb[11].mxu1  ;;  %v1510_v23 = vpop.f32.mrb[23].mxu0 }
 0x249   :  { %v595_v24 = vpop.f32.mrb[12].mxu1  ;;  %v641_v25 = vpop.f32.mrb[24].mxu0 }
 0x24a   :  { %v1515_v26 = vpop.f32.mrb[13].mxu1  ;;  %v1521_v28 = vpop.f32.mrb[25].mxu0  ;;  %v666_v29 = vsel %vm647_vm3, %v595_v24, -inf  ;;  %v669_v30 = vsel %vm647_vm3, %v641_v25, -inf }
 0x24b   :  { %v598_v31 = vpop.f32.mrb[14].mxu1  ;;  %667 = vmax.xlane.f32.xlu1 %v666_v29  ;;  %670 = vmax.xlane.f32.xlu0 %v669_v30  ;;  %v644_v32 = vpop.f32.mrb[26].mxu0 }
 0x24c   :  { %v1516_v33 = vpop.f32.mrb[15].mxu1  ;;  %v1522_v34 = vpop.f32.mrb[27].mxu0 }
 0x251   :  { %v650_v40 = vpop.xlane.xlu0 %649 }
 0x252   :  { %v672_v41 = vsub.f32 %v319_v57, %v650_v40 }
 0x253   :  { %v653_v35 = vpop.xlane.xlu1 %652 }
 0x254   :  { %v673_v36 = vsub.f32 %v365_v61, %v653_v35  ;;  %v680_v42 = vmul.f32 1.442695, %v672_v41 }
 0x256   :  { %v682_v37 = vmul.f32 1.442695, %v673_v36 }
 0x258   :  { %1627 = vpow2.f32 %v682_v37 }
 0x259   :  { %1629 = vpow2.f32 %v680_v42 }
 0x25c   :  { %257 = vrot.lane.b32.xlu1 %v1782_v27, %s1686_s8 }
 0x262   :  { %v1628_v38 = vpop.eup %1627 }
 0x263   :  { %v699_v39 = vsel %vm647_vm3, %v1628_v38, 0.0  ;;  %v1829_v43 = vpop.eup %1629 }
 0x264   :  { %700 = vadd.xlane.f32.xlu0 %v699_v39  ;;  %v696_v44 = vsel %vm647_vm3, %v1829_v43, 0.0 }
 0x280   :  { %697 = vadd.xlane.f32.xlu1 %v696_v44 }
 0x2c8   :  { %v656_v45 = vpop.xlane.xlu0 %655 }
 0x2c9   :  { %v674_v46 = vsub.f32 %v411_v4, %v656_v45 }
 0x2cb   :  { %v684_v47 = vmul.f32 1.442695, %v674_v46 }
 0x2cc   :  { %v659_v48 = vpop.xlane.xlu0 %658 }
 0x2cd   :  { %1631 = vpow2.f32 %v684_v47  ;;  %v675_v49 = vsub.f32 %v457_v5, %v659_v48 }
 0x2cf   :  { %v686_v50 = vmul.f32 1.442695, %v675_v49 }
 0x2d0   :  { %v662_v51 = vpop.xlane.xlu1 %661  ;;  %v665_v52 = vpop.xlane.xlu0 %664 }
 0x2d1   :  { %1633 = vpow2.f32 %v686_v50  ;;  %v676_v53 = vsub.f32 %v503_v14, %v662_v51  ;;  %v677_v54 = vsub.f32 %v549_v15, %v665_v52 }
 0x2d3   :  { %v688_v55 = vmul.f32 1.442695, %v676_v53  ;;  %v690_v56 = vmul.f32 1.442695, %v677_v54 }
 0x2d5   :  { %1635 = vpow2.f32 %v688_v55 }
 0x2d6   :  { %1637 = vpow2.f32 %v690_v56 }
 0x2d7   :  { %v1632_v57 = vpop.eup %1631 }
 0x2d8   :  { %v668_v58 = vpop.xlane.xlu1 %667  ;;  %v671_v59 = vpop.xlane.xlu0 %670  ;;  %v702_v60 = vsel %vm647_vm3, %v1632_v57, 0.0 }
 0x2d9   :  { %v678_v61 = vsub.f32 %v595_v24, %v668_v58  ;;  %v679_v62 = vsub.f32 %v641_v25, %v671_v59  ;;  %703 = vadd.xlane.f32.xlu1 %v702_v60 }
 0x2db   :  { %v1634_v63 = vpop.eup %1633  ;;  %v692_v0 = vmul.f32 1.442695, %v678_v61  ;;  %v694_v2 = vmul.f32 1.442695, %v679_v62 }
 0x2dc   :  { %v705_v3 = vsel %vm647_vm3, %v1634_v63, 0.0  ;;  %v258_v13 = vpop.permute.xlu1 %257 }
 0x2dd   :  { %1639 = vpow2.f32 %v692_v0  ;;  %706 = vadd.xlane.f32.xlu0 %v705_v3  ;;  %v1364_v15 = vcombine.high %v258_v13, %v258_v13  ;;  %v1363_v21 = vcombine.low %v258_v13, %v258_v13  ;;  %v1620_v0 = vld [vmem:[%s1975_s4 + $0x8] sm:$0xff]  }
 0x2de   :  { %1641 = vpow2.f32 %v694_v2  ;;  %v1621_v2 = vld [vmem:[%s1975_s4 + $0x10] sm:$0xff]   ;;  %v1624_v13 = vld [vmem:[%s1975_s4 + $0x28] sm:$0xff]  }
 0x2df   :  { %v1835_v4 = vpop.eup %1635  ;;  %v887_v18 = vsel %vm747_vm2, %v1364_v15, 0 }
 0x2e0   :  { %v1837_v5 = vpop.eup %1637  ;;  %v708_v6 = vsel %vm647_vm3, %v1835_v4, 0.0 }
 0x2e1   :  { %709 = vadd.xlane.f32.xlu1 %v708_v6  ;;  %v711_v7 = vsel %vm647_vm3, %v1837_v5, 0.0 }
 0x2e2   :  { %712 = vadd.xlane.f32.xlu0 %v711_v7  ;;  %v1622_v7 = vld [vmem:[%s1975_s4 + $0x18] sm:$0xff]  }
 0x2e7   :  { %v1843_v8 = vpop.eup %1639 }
 0x2e8   :  { %v1845_v9 = vpop.eup %1641  ;;  %v714_v10 = vsel %vm647_vm3, %v1843_v8, 0.0 }
 0x2e9   :  { %715 = vadd.xlane.f32.xlu1 %v714_v10  ;;  %v717_v11 = vsel %vm647_vm3, %v1845_v9, 0.0 }
 0x2ea   :  { %718 = vadd.xlane.f32.xlu0 %v717_v11 }
 0x2f1   :  { %v701_v12 = vpop.xlane.xlu0 %700 }
 0x2f2   :  { %1643 = vrcp.f32 %v701_v12 }
 0x2fa   :  { %261 = vrot.lane.b32.xlu1 %v1782_v27, %s1687_s9 }
 0x2fc   :  { %v1644_v14 = vpop.eup %1643 }
 0x2fd   :  { %v729_v16 = vmul.f32 %v1644_v14, %v1628_v38 }
 0x2ff   :  { %v737_v17 = vpack.c.bf16 %v729_v16, %v729_v16 }
 0x300   :  { %259 = vrot.lane.b32.xlu0 %v1782_v27, %s1685_s3  ;;  %v841_v27 = vsel %vm747_vm2, %v1363_v21, 0 }
 0x301   :  { %1532 = vmatmul.mubr.msk.bf16.vlgmr.msra.gmra.mrb[28].mxu0 %vm647_vm3, %v737_v17  ;;  %v1625_v17 = vld [vmem:[%s1975_s4 + $0x30] sm:$0xff]  }
 0x302   :  { %1542 = vmatpush3.bf16.msra.mxu0 %v887_v18  ;;  %1543 = vmatprep.mubr.msk.bf16.mxu0 %vm1684_vm0, %v1683_v1 }
 0x303   :  { %1553 = vmatprep.subr.bf16.mxu0 %v1683_v1 }
 0x30d   :  { %v698_v19 = vpop.xlane.xlu1 %697 }
 0x30e   :  { %1645 = vrcp.f32 %v698_v19 }
 0x318   :  { %v1646_v20 = vpop.eup %1645 }
 0x319   :  { %v728_v22 = vmul.f32 %v1646_v20, %v1829_v43  ;;  %v1626_v20 = vld [vmem:[%s1975_s4 + $0x38] sm:$0xff]  }
 0x31b   :  { %v736_v23 = vpack.c.bf16 %v728_v22, %v728_v22 }
 0x31d   :  { %1526 = vmatmul.mubr.msk.bf16.vlgmr.msra.gmra.mrb[16].mxu1 %vm647_vm3, %v736_v23 }
 0x31e   :  { %1536 = vmatpush3.bf16.msra.mxu1 %v841_v27  ;;  %1537 = vmatprep.mubr.msk.bf16.mxu1 %vm1684_vm0, %v1683_v1 }
 0x31f   :  { %1547 = vmatprep.subr.bf16.mxu1 %v1683_v1 }
 0x366   :  { %v704_v24 = vpop.xlane.xlu1 %703 }
 0x367   :  { %1647 = vrcp.f32 %v704_v24 }
 0x36a   :  { %v707_v25 = vpop.xlane.xlu0 %706 }
 0x36b   :  { %1649 = vrcp.f32 %v707_v25 }
 0x36e   :  { %v710_v26 = vpop.xlane.xlu1 %709 }
 0x36f   :  { %1651 = vrcp.f32 %v710_v26  ;;  %v713_v28 = vpop.xlane.xlu0 %712 }
 0x370   :  { %1653 = vrcp.f32 %v713_v28 }
 0x371   :  { %v1648_v29 = vpop.eup %1647 }
 0x372   :  { %v730_v30 = vmul.f32 %v1648_v29, %v1632_v57 }
 0x374   :  { %v738_v31 = vpack.c.bf16 %v730_v30, %v730_v30 }
 0x375   :  { %v1650_v32 = vpop.eup %1649 }
 0x376   :  { %v731_v33 = vmul.f32 %v1650_v32, %v1634_v63  ;;  %1538 = vmatmul.mubr.msk.bf16.vlgmr.msra.gmra.mrb[20].mxu1 %vm647_vm3, %v738_v31  ;;  %v716_v34 = vpop.xlane.xlu1 %715  ;;  %v1619_v63 = vld [vmem:[%s1975_s4] sm:$0xff]  }
 0x377   :  { %1655 = vrcp.f32 %v716_v34  ;;  %v719_v35 = vpop.xlane.xlu0 %718  ;;  %1549 = vmatprep.mubr.msk.bf16.mxu1 %vm1684_vm0, %v1683_v1 }
 0x378   :  { %1657 = vrcp.f32 %v719_v35  ;;  %v739_v36 = vpack.c.bf16 %v731_v33, %v731_v33 }
 0x379   :  { %v1652_v37 = vpop.eup %1651 }
 0x37a   :  { %v1654_v38 = vpop.eup %1653  ;;  %1544 = vmatmul.mubr.msk.bf16.vlgmr.msra.gmra.mrb[32].mxu0 %vm647_vm3, %v739_v36  ;;  %v262_v39 = vpop.permute.xlu1 %261  ;;  %v732_v41 = vmul.f32 %v1652_v37, %v1835_v4 }
 0x37b   :  { %v260_v40 = vpop.permute.xlu0 %259  ;;  %1555 = vmatprep.mubr.msk.bf16.mxu0 %vm1684_vm0, %v1683_v1  ;;  %v733_v42 = vmul.f32 %v1654_v38, %v1837_v5  ;;  %v1367_v45 = vcombine.low %v262_v39, %v262_v39  ;;  %v1368_v46 = vcombine.high %v262_v39, %v262_v39 }
 0x37c   :  { %v1365_v43 = vcombine.low %v260_v40, %v260_v40  ;;  %v1366_v44 = vcombine.high %v260_v40, %v260_v40  ;;  %v740_v49 = vpack.c.bf16 %v732_v41, %v732_v41 }
 0x37d   :  { %v741_v50 = vpack.c.bf16 %v733_v42, %v733_v42  ;;  %v1025_v53 = vsel %vm747_vm2, %v1367_v45, 0  ;;  %v1071_v54 = vsel %vm747_vm2, %v1368_v46, 0 }
 0x37e   :  { %v933_v47 = vsel %vm747_vm2, %v1365_v43, 0  ;;  %v979_v48 = vsel %vm747_vm2, %v1366_v44, 0 }
 0x37f   :  { %1548 = vmatpush3.bf16.msra.mxu1 %v933_v47  ;;  %1554 = vmatpush3.bf16.msra.mxu0 %v979_v48 }
 0x380   :  { %1559 = vmatprep.subr.bf16.mxu1 %v1683_v1  ;;  %1565 = vmatprep.subr.bf16.mxu0 %v1683_v1 }
 0x381   :  { %v1656_v51 = vpop.eup %1655 }
 0x382   :  { %v1658_v52 = vpop.eup %1657  ;;  %1550 = vmatmul.mubr.msk.bf16.vlgmr.msra.gmra.mrb[24].mxu1 %vm647_vm3, %v740_v49  ;;  %1556 = vmatmul.mubr.msk.bf16.vlgmr.msra.gmra.mrb[36].mxu0 %vm647_vm3, %v741_v50  ;;  %v734_v55 = vmul.f32 %v1656_v51, %v1843_v8  ;;  %v1623_v8 = vld [vmem:[%s1975_s4 + $0x20] sm:$0xff]  }
 0x383   :  { %1560 = vmatpush3.bf16.msra.mxu1 %v1025_v53  ;;  %1566 = vmatpush3.bf16.msra.mxu0 %v1071_v54  ;;  %v735_v56 = vmul.f32 %v1658_v52, %v1845_v9  ;;  %v1385_v54 = vld [vmem:[%s1976_s5] ss:$0 sm:$0xff]  ;;  %s1688_s5 = smov [#allocation2]  }
 0x384   :  { %1561 = vmatprep.mubr.msk.bf16.mxu1 %vm1684_vm0, %v1683_v1  ;;  %1567 = vmatprep.mubr.msk.bf16.mxu0 %vm1684_vm0, %v1683_v1  ;;  %v742_v57 = vpack.c.bf16 %v734_v55, %v734_v55  ;;  %s1327_s27 = sshll.u32 %s1688_s5, 4  ;;  %s1328_s27 = int_to_ptr.vmem [resolvable:$true] %s1327_s27 }
 0x385   :  { %1571 = vmatprep.subr.bf16.mxu1 %v1683_v1  ;;  %v743_v58 = vpack.c.bf16 %v735_v56, %v735_v56  ;;  %s1659_s28 = scalar_lea.vmem %s1328_s27, 64  ;;  %p1664_p1 = scmp.lt.s32.totalorder %s1328_s27, %s1328_s27 }
 0x386   :  { %p1660_p0 = scmp.ne.s32.totalorder %s1328_s27, %s1659_s28  ;;  %p1665_p2 = scmp.lt.s32.totalorder %s1659_s28, %s1659_s28 }
 0x388   :  { %p1666_p3 = por %p1665_p2, %p1664_p1 }
 0x38a   :  { %1562 = vmatmul.mubr.msk.bf16.vlgmr.msra.gmra.mrb[28].mxu1 %vm647_vm3, %v742_v57  ;;  %1568 = vmatmul.mubr.msk.bf16.vlgmr.msra.gmra.mrb[40].mxu0 %vm647_vm3, %v743_v58  ;;  %p1667_p4 = pnand %p1666_p3, %p1660_p0 }
 0x38b   :  { %1587 = vmatprep.mubr.msk.bf16.mxu1 %vm1684_vm0, %v1683_v1  ;;  %1572 = vmatpush3.bf16.msra.mxu1 %v1619_v63 }
 0x38c   :  { %1573 = vmatprep.subr.bf16.mxu1 %v1683_v1 }
 0x38f   :  { %1574 = vmatpush3.bf16.msra.mxu1 %v1620_v0 }
 0x390   :  { %1575 = vmatprep.subr.bf16.mxu1 %v1683_v1 }
 0x393   :  { %1576 = vmatpush3.bf16.msra.mxu1 %v1621_v2 }
 0x394   :  { %1577 = vmatprep.subr.bf16.mxu1 %v1683_v1 }
 0x397   :  { %1578 = vmatpush3.bf16.msra.mxu1 %v1622_v7 }
 0x398   :  { %1579 = vmatprep.subr.bf16.mxu1 %v1683_v1 }
 0x39b   :  { %1580 = vmatpush3.bf16.msra.mxu1 %v1623_v8 }
 0x39c   :  { %1581 = vmatprep.subr.bf16.mxu1 %v1683_v1 }
 0x39f   :  { %1582 = vmatpush3.bf16.msra.mxu1 %v1624_v13 }
 0x3a0   :  { %1583 = vmatprep.subr.bf16.mxu1 %v1683_v1 }
 0x3a3   :  { %1584 = vmatpush3.bf16.msra.mxu1 %v1625_v17 }
 0x3a4   :  { %1585 = vmatprep.subr.bf16.mxu1 %v1683_v1 }
 0x3a7   :  { %1586 = vmatpush3.bf16.msra.mxu1 %v1626_v20 }
 0x3d4   :  { %v1893_v59 = vpop.f32.mrb[28].mxu0 }
 0x3d5   :  { %v1533_v60 = vpop.f32.mrb[29].mxu0 }
 0x3d6   :  { %v834_v61 = vpop.f32.mrb[30].mxu0 }
 0x3d7   :  { %v1534_v62 = vpop.f32.mrb[31].mxu0 }
 0x3f0   :  { %v785_v3 = vpop.f32.mrb[16].mxu1 }
 0x3f1   :  { %v1527_v4 = vpop.f32.mrb[17].mxu1 }
 0x3f2   :  { %v788_v5 = vpop.f32.mrb[18].mxu1 }
 0x3f3   :  { %v1528_v6 = vpop.f32.mrb[19].mxu1 }
 0x449   :  { %v877_v9 = vpop.f32.mrb[20].mxu1 }
 0x44a   :  { %v1539_v10 = vpop.f32.mrb[21].mxu1 }
 0x44b   :  { %v880_v11 = vpop.f32.mrb[22].mxu1 }
 0x44c   :  { %v1540_v12 = vpop.f32.mrb[23].mxu1 }
 0x44d   :  { %v923_v14 = vpop.f32.mrb[32].mxu0 }
 0x44e   :  { %v1597_v15 = vpack.i.bf16 %v923_v14, %v877_v9  ;;  %v1545_v16 = vpop.f32.mrb[33].mxu0 }
 0x44f   :  { %v926_v18 = vpop.f32.mrb[34].mxu0 }
 0x450   :  { %1598 = vrot.lane.b32.xlu1 %v1597_v15, %s1687_s9  ;;  %v1546_v19 = vpop.f32.mrb[35].mxu0 }
 0x455   :  { %v969_v21 = vpop.f32.mrb[24].mxu1  ;;  %v1015_v22 = vpop.f32.mrb[36].mxu0 }
 0x456   :  { %v1551_v23 = vpop.f32.mrb[25].mxu1  ;;  %v1602_v27 = vpack.i.bf16 %v1015_v22, %v969_v21  ;;  %v1557_v24 = vpop.f32.mrb[37].mxu0 }
 0x457   :  { %v972_v25 = vpop.f32.mrb[26].mxu1  ;;  %v1018_v26 = vpop.f32.mrb[38].mxu0 }
 0x458   :  { %v1552_v28 = vpop.f32.mrb[27].mxu1  ;;  %1603 = vrot.lane.b32.xlu0 %v1602_v27, %s1685_s3  ;;  %v1558_v29 = vpop.f32.mrb[39].mxu0 }
 0x45d   :  { %v1061_v30 = vpop.f32.mrb[28].mxu1  ;;  %v1107_v31 = vpop.f32.mrb[40].mxu0 }
 0x45e   :  { %v1563_v32 = vpop.f32.mrb[29].mxu1  ;;  %v1607_v1 = vpack.i.bf16 %v1107_v31, %v1061_v30  ;;  %v1569_v33 = vpop.f32.mrb[41].mxu0 }
 0x45f   :  { %v1064_v34 = vpop.f32.mrb[30].mxu1  ;;  %v1110_v35 = vpop.f32.mrb[42].mxu0 }
 0x460   :  { %v1564_v36 = vpop.f32.mrb[31].mxu1  ;;  %1608 = vrot.lane.b32.xlu1 %v1607_v1, %s1686_s8  ;;  %v1570_v37 = vpop.f32.mrb[43].mxu0 }
 0x4c2   :  { %v1599_v38 = vpop.permute.xlu1 %1598 }
 0x4c3   :  { %v1601_v40 = vunpack.i.h.bf16 %v1599_v38  ;;  %v1600_v41 = vunpack.i.l.bf16 %v1599_v38 }
 0x4c5   :  { %v1138_v45 = vsel %vm48_vm1, %v1893_v59, %v1601_v40  ;;  %v1137_v46 = vsel %vm48_vm1, %v785_v3, %v1600_v41 }
 0x4ca   :  { %v1604_v39 = vpop.permute.xlu0 %1603 }
 0x4cb   :  { %v1606_v42 = vunpack.i.h.bf16 %v1604_v39  ;;  %v1605_v43 = vunpack.i.l.bf16 %v1604_v39 }
 0x4cd   :  { %v1141_v49 = vsel %vm1139_vm4, %v1138_v45, %v1606_v42  ;;  %v1140_v50 = vsel %vm1139_vm4, %v1137_v46, %v1605_v43 }
 0x4d2   :  { %v1609_v44 = vpop.permute.xlu1 %1608 }
 0x4d3   :  { %v1611_v47 = vunpack.i.h.bf16 %v1609_v44  ;;  %v1610_v48 = vunpack.i.l.bf16 %v1609_v44 }
 0x4d5   :  { %v1144_v51 = vsel %vm1142_vm5, %v1141_v49, %v1611_v47  ;;  %v1143_v52 = vsel %vm1142_vm5, %v1140_v50, %v1610_v48 }
 0x4d6   :  { %v1145_v53 = vpack.c.bf16 %v1144_v51, %v1143_v52 }
 0x4d8   :  { %1588 = vmatmul.mubr.bf16.vlgmr.msra.gmra.mrb[32].mxu1 %v1145_v53 }
 0x5ab   :  { %v1251_v55 = vpop.f32.mrb[32].mxu1 }
 0x5ac   :  { %v1252_v56 = vadd.f32 %v1385_v54, %v1251_v55  ;;  %v1589_v57 = vpop.f32.mrb[33].mxu1 }
 0x5ad   :  { %v1254_v58 = vpop.f32.mrb[34].mxu1 }
 0x5ae   :  { %v1255_v59 = vadd.f32 %v1385_v54, %v1254_v58  ;;  %v1590_v60 = vpop.f32.mrb[35].mxu1  ;;  %v1264_v61 = vrot.slane %v1252_v56, 1  ;;  %v1285_v62 = vrot.slane %v1252_v56, 5  ;;  %v1269_v63 = vrot.slane %v1252_v56, 2 }
 0x5af   :  { %v1291_v0 = vrot.slane %v1252_v56, 6  ;;  %v1275_v2 = vrot.slane %v1252_v56, 3  ;;  %v1297_v3 = vrot.slane %v1252_v56, 7  ;;  %v1281_v4 = vrot.slane %v1252_v56, 4 }
 0x5b0   :  { %v1265_v5 = vsel %vm1261_vm6, %v1255_v59, %v1264_v61  ;;  %v1286_v6 = vrot.slane %v1255_v59, 4  ;;  %v1270_v7 = vrot.slane %v1255_v59, 1  ;;  %v1292_v8 = vrot.slane %v1255_v59, 5 }
 0x5b1   :  { %1266 = vrot.lane.b32.xlu0 %v1265_v5, %s1687_s9  ;;  %v1276_v9 = vrot.slane %v1255_v59, 2  ;;  %v1298_v10 = vrot.slane %v1255_v59, 6  ;;  %v1260_v11 = vrot.slane %v1255_v59, 7  ;;  %v1282_v12 = vrot.slane %v1255_v59, 3 }
 0x5b2   :  { %v1287_v13 = vsel %vm1261_vm6, %v1286_v6, %v1285_v62  ;;  %v1271_v14 = vsel %vm1261_vm6, %v1270_v7, %v1269_v63  ;;  %v1293_v15 = vsel %vm1261_vm6, %v1292_v8, %v1291_v0 }
 0x5b3   :  { %1288 = vrot.lane.b32.xlu1 %v1287_v13, %s1687_s9  ;;  %v1277_v16 = vsel %vm1261_vm6, %v1276_v9, %v1275_v2  ;;  %v1299_v17 = vsel %vm1261_vm6, %v1298_v10, %v1297_v3  ;;  %v1262_v18 = vsel %vm1261_vm6, %v1260_v11, %v1252_v56  ;;  %v1283_v19 = vsel %vm1261_vm6, %v1282_v12, %v1281_v4 }
 0x5b5   :  { %1272 = vrot.lane.b32.xlu0 %v1271_v14, %s1685_s3 }
 0x5b7   :  { %1294 = vrot.lane.b32.xlu1 %v1293_v15, %s1685_s3 }
 0x5b9   :  { %1278 = vrot.lane.b32.xlu0 %v1277_v16, %s1686_s8 }
 0x5bb   :  { %1300 = vrot.lane.b32.xlu1 %v1299_v17, %s1686_s8 }
 0x623   :  { %v1267_v20 = vpop.permute.xlu0 %1266 }
 0x624   :  { %v1303_v24 = vsel %vm48_vm1, %v1262_v18, %v1267_v20 }
 0x625   :  { %v1289_v21 = vpop.permute.xlu1 %1288 }
 0x626   :  { %v1306_v25 = vsel %vm48_vm1, %v1283_v19, %v1289_v21 }
 0x627   :  { %v1273_v22 = vpop.permute.xlu0 %1272 }
 0x628   :  { %v1304_v26 = vsel %vm1139_vm4, %v1303_v24, %v1273_v22 }
 0x629   :  { %v1295_v23 = vpop.permute.xlu1 %1294 }
 0x62a   :  { %v1307_v28 = vsel %vm1139_vm4, %v1306_v25, %v1295_v23 }
 0x62b   :  { %v1279_v27 = vpop.permute.xlu0 %1278 }
 0x62c   :  { %v1305_v30 = vsel %vm1142_vm5, %v1304_v26, %v1279_v27 }
 0x62d   :  { %v1301_v29 = vpop.permute.xlu1 %1300 }
 0x62e   :  { %v1308_v31 = vsel %vm1142_vm5, %v1307_v28, %v1301_v29 }
 0x62f   :  { %v1311_v32 = vcombine.low %v1305_v30, %v1308_v31 }
 0x631   :  { %1394 = vst.sshfl [vmem:[#allocation2] sm:$0x33 pattern:$0x76325410] %v1311_v32 }
 0x632   :  { %1670 = shalt.err (!%p1667_p4)
}
 0x633   :  { %s1671_s0 = scalar_lea.hbm %s1977_s6, 64 }
 0x634   :  { %p1672_p5 = scmp.ne.s32.totalorder %s1977_s6, %s1671_s0  ;;  %p1675_p6 = scmp.lt.u32.totalorder %s1671_s0, %s1977_s6 }
 0x636   :  { %p1677_p7 = pnand %p1675_p6, %p1672_p5 }
 0x638   :  { %1680 = shalt.err (!%p1677_p7)
}
 0x639   :  { %1330 = dma.vmem_to_hbm [thread:$0]  %s1328_s27, 64, %s1977_s6, [#allocation3]  }
 0x63a   :  { %1681 = dma.done.wait [#allocation3], 64  }
 0x63b   :  { %1682 = vsyncadd [#allocation3], 4294967232 }
 0x63c   :  { %1334 = vsyncpa [#allocation3], 1 }

</bundles_post_ra>
